<compile_context>
chip_gen: v7x
topology: tpu7x:2x2x1
jax: 0.10.0
libtpu: 0.0.40
codegen_flags: <defaults>
</compile_context>

<pallas_src>
import functools
import math

import jax
import jax.numpy as jnp
from jax import lax
from jax.experimental import pallas as pl
from jax.experimental.pallas import tpu as pltpu

# Scoped-VMEM ceiling: well under the 64 MiB physical VMEM of a v7x TensorCore,
# plenty of headroom on v5e/v6e (128 MiB).  Actual per-call usage is a few MiB.
VMEM_LIMIT_BYTES = 48 * 1024 * 1024


def _round_up(x, m):
    return ((x + m - 1) // m) * m


# ----------------------------------------------------------------------------
# Pallas kernels
# ----------------------------------------------------------------------------
def _matmul_kernel(x_ref, w_ref, o_ref, acc_ref, *, k_rem):
    """One (tm, tn) output tile, reduced over the (innermost) K grid axis."""
    k = pl.program_id(2)

    @pl.when(k == 0)
    def _():
        acc_ref[...] = jnp.zeros_like(acc_ref)

    x = x_ref[...]
    w = w_ref[...]
    if k_rem:  # static: K is not a multiple of tk -> zero the tail of the last K block
        kmax = jnp.where(k == pl.num_programs(2) - 1, k_rem, x.shape[1])
        x = jnp.where(lax.broadcasted_iota(jnp.int32, x.shape, 1) < kmax, x,
                      jnp.zeros_like(x))
        w = jnp.where(lax.broadcasted_iota(jnp.int32, w.shape, 0) < kmax, w,
                      jnp.zeros_like(w))
    acc_ref[...] += jnp.dot(x, w, preferred_element_type=jnp.float32)

    @pl.when(k == pl.num_programs(2) - 1)
    def _():
        o_ref[...] = acc_ref[...]


def matmul_pallas(x, w, *, tm=512, tk_max=1024):
    """y = x @ w with f32 accumulation (bf16 operands preferred).

    Pallas only where it wins: lane-dense N (>= 128) and enough rows for a few
    M tiles.  Tiny matmuls (e.g. the trailing 512->32 / 32->10 classifier
    linears) stay in plain XLA where launch / padding overhead would dominate.
    """
    M, K = x.shape
    K2, N = w.shape
    assert K == K2
    if N < 128 or M < 256:
        return jnp.dot(x, w, preferred_element_type=jnp.float32)

    # N (lane) tiling: no padding unless N is a ragged non-multiple of 128.
    if N % 128 == 0:
        Np, tn = N, (256 if N % 256 == 0 else 128)
    else:
        Np, tn = _round_up(N, 128), 128
        w = jnp.pad(w, ((0, 0), (0, Np - N)))

    # M tiling: bf16 sublane grain is 16; partial last block -> masked stores.
    tm = min(tm, _round_up(M, 16))

    # K tiling: never pad the (large) activation matrix on the host.  Full K
    # when it fits; else the largest 128-multiple divisor of K <= tk_max; as a
    # last resort an in-kernel mask on the K tail.
    if K <= tk_max:
        tk = K
    else:
        tk = next((c for c in range(tk_max - tk_max % 128, 0, -128) if K % c == 0),
                  tk_max)
    k_rem = K % tk

    grid = (pl.cdiv(M, tm), Np // tn, pl.cdiv(K, tk))
    y = pl.pallas_call(
        functools.partial(_matmul_kernel, k_rem=k_rem),
        grid=grid,
        in_specs=[
            pl.BlockSpec((tm, tk), lambda i, j, k: (i, k)),
            pl.BlockSpec((tk, tn), lambda i, j, k: (k, j)),
        ],
        out_specs=pl.BlockSpec((tm, tn), lambda i, j, k: (i, j)),
        out_shape=jax.ShapeDtypeStruct((M, Np), jnp.float32),
        scratch_shapes=[pltpu.VMEM((tm, tn), jnp.float32)],
        compiler_params=pltpu.CompilerParams(
            dimension_semantics=("parallel", "parallel", "arbitrary"),
            vmem_limit_bytes=VMEM_LIMIT_BYTES,
        ),
    )(x, w)
    return y if Np == N else y[:, :N]


def _relaxed_relu_kernel(x_ref, bias_ref, adv_ref, o_ref):
    """DeepZ ReLU relaxation on one lane-dense feature tile.

    x_ref   : [B, 1+E, td]  combined (slot 0 = pre-bias head, 1.. = error terms)
    bias_ref: [1, td]       head-only additive term (layer bias / norm shift)
    adv_ref : [B, td]       adversarial direction in [-1, 1]
    o_ref   : [B, E+2, td]  bf16: slot 0 = new head, 1..E = scaled errors,
                            E+1 = appended mu*adv error term
    """
    x = x_ref[...].astype(jnp.float32)
    n_err = x.shape[1] - 1
    head = x[:, 0, :] + bias_ref[...]              # bias fused here (head only)
    err = x[:, 1:, :]
    adv = adv_ref[...].astype(jnp.float32)

    l1 = jnp.sum(jnp.abs(err), axis=1)             # zonotope box radius
    lb = head - l1
    ub = head + l1
    is_cross = jnp.logical_and(lb < 0.0, ub > 0.0)
    inv = pl.reciprocal(ub - lb + 1e-6, approx=False)   # exact: keep relaxation sound
    lam = jnp.where(is_cross, ub * inv, (lb >= 0.0).astype(jnp.float32))
    mu = jnp.where(is_cross, -0.5 * ub * lb * inv, 0.0)

    o_ref[:, 0, :] = (lam * head + mu).astype(o_ref.dtype)
    if n_err > 0:
        o_ref[:, 1:n_err + 1, :] = (err * lam[:, None, :]).astype(o_ref.dtype)
    o_ref[:, n_err + 1:, :] = ((mu * adv)[:, None, :]).astype(o_ref.dtype)


def relaxed_relu_pallas(x_comb, bias_row, adv):
    """DeepZ ReLU relaxation, tiled over the feature dim D.

    x_comb: [B, 1+E, D] (f32 or bf16), bias_row: [1, D] f32, adv: [B, D] f32.
    Returns the combined [B, E+2, D] bf16 tensor (head in slot 0, appended
    error term in the last slot) - no post-kernel concatenate or cast.
    """
    B, G, D = x_comb.shape

    if D % 128 == 0:
        td = min(512, D)
        if td == D and D % 256 == 0 and D > 128:
            td = D // 2          # >= 2 parallel blocks -> both v7x TCs get work
        # keep per-block footprint modest for nets with many error terms
        # (v7x has only 64 MiB VMEM per TensorCore)
        blk_bytes = B * td * (G * 4 + (G + 2) * 2 + 8)
        while td > 128 and (td // 2) % 128 == 0 and 2 * blk_bytes > (12 << 20):
            td //= 2
            blk_bytes //= 2
        # TODO(synk): for E in the hundreds, additionally stream the E axis with
        # an f32 accumulator instead of holding the full error extent per block.
    else:
        td = D                   # small / ragged feature dim: one full block

    grid = (pl.cdiv(D, td),)
    return pl.pallas_call(
        _relaxed_relu_kernel,
        grid=grid,
        in_specs=[
            pl.BlockSpec((B, G, td), lambda d: (0, 0, d)),
            pl.BlockSpec((1, td), lambda d: (0, d)),
            pl.BlockSpec((B, td), lambda d: (0, d)),
        ],
        out_specs=pl.BlockSpec((B, G + 1, td), lambda d: (0, 0, d)),
        out_shape=jax.ShapeDtypeStruct((B, G + 1, D), jnp.bfloat16),
        compiler_params=pltpu.CompilerParams(
            dimension_semantics=("parallel",),
            vmem_limit_bytes=VMEM_LIMIT_BYTES,
        ),
    )(x_comb, bias_row, adv)


# ----------------------------------------------------------------------------
# Glue: channels-last im2col + per-block relaxed propagation
# ----------------------------------------------------------------------------
def im2col_nhwc(x, kh, kw, stride, pad):
    """x: [N, H, W, C] -> ([N*Ho*Wo, kh*kw*C], Ho, Wo); feature order (kh, kw, C).

    Channels-last: the conv matmul result is already NHWC (no transposes on
    either side of the matmul).
    TODO(synk): fuse this patch gather into the conv matmul kernel (VMEM-side
    im2col via strided in-kernel reads) to remove the kh*kw-expanded HBM matrix.
    """
    N, H, W, C = x.shape
    Ho = (H + 2 * pad - kh) // stride + 1
    Wo = (W + 2 * pad - kw) // stride + 1
    xp = jnp.pad(x, ((0, 0), (pad, pad), (pad, pad), (0, 0)))
    slices = [
        xp[:, i:i + stride * Ho:stride, j:j + stride * Wo:stride, :]
        for i in range(kh) for j in range(kw)
    ]
    p = jnp.stack(slices, axis=3)                     # [N, Ho, Wo, kh*kw, C]
    return p.reshape(N * Ho * Wo, kh * kw * C), Ho, Wo


def relaxed_conv2d_combined(curr, weight, stride, pad):
    """Conv (no bias) applied jointly to the head and every error term.

    curr: [B, 1+E, H, W, C] channels-last (bf16).
    Returns ([B, 1+E, Ho, Wo, Cout] f32, (Ho, Wo, Cout)).
    """
    B, G, H, W, C = curr.shape
    Cout, Cin, kh, kw = weight.shape
    x = curr.reshape(B * G, H, W, C)
    patches, Ho, Wo = im2col_nhwc(x, kh, kw, stride, pad)
    w_mat = jnp.transpose(weight, (2, 3, 1, 0)).reshape(kh * kw * Cin, Cout)
    y = matmul_pallas(patches.astype(jnp.bfloat16), w_mat.astype(jnp.bfloat16))
    return y.reshape(B, G, Ho, Wo, Cout), (Ho, Wo, Cout)


def conv_single_map(fmap, weight, stride, pad):
    """Conv (no bias) on a single f32 channels-last map (the pending head-only term)."""
    Cout, Cin, kh, kw = weight.shape
    patches, Ho, Wo = im2col_nhwc(fmap[None].astype(jnp.float32), kh, kw, stride, pad)
    w_mat = jnp.transpose(weight, (2, 3, 1, 0)).reshape(kh * kw * Cin, Cout)
    return jnp.dot(patches, w_mat.astype(jnp.float32)).reshape(Ho, Wo, Cout)


class RelaxedNetworkPallas:
    """JAX/Pallas re-implementation of RelaxedNetwork.forward (adv_errors path).

    Internal state between layers is ONE combined channels-last bf16 tensor
    (slot 0 = head, slots 1.. = error terms) plus a small f32 head-only
    "pending" additive term (biases / normalization shift) that is pushed
    analytically through linear layers and materialized inside the ReLU
    relaxation kernel (or folded into the final latent).
    """

    def __init__(self, blocks, n_rand_proj=None):
        self.blocks = blocks
        self.n_rand_proj = n_rand_proj

    def propagate(self, head, errors, layer_idx=None, adv_errors=None):
        adv_errors = {} if adv_errors is None else adv_errors

        if head.ndim == 4:                               # NCHW -> channels-last, once
            head_cl = jnp.transpose(head, (0, 2, 3, 1))
            err_cl = jnp.transpose(errors, (0, 1, 3, 4, 2))
        else:
            head_cl, err_cl = head, errors
        curr = jnp.concatenate([head_cl[:, None], err_cl], axis=1).astype(jnp.bfloat16)
        pending = None                                    # f32, shape == curr.shape[2:]
        flat_from_nhwc = None                             # (H, W, C) if flattened from conv features

        for j, blk in enumerate(self.blocks):
            if layer_idx is not None and j > layer_idx:
                continue
            kind = blk[0]

            if kind == "norm":
                mean, sigma = blk[1], blk[2]
                curr = (curr / sigma).astype(jnp.bfloat16)            # all slots / sigma
                shift = jnp.broadcast_to(-mean / sigma, curr.shape[2:]).astype(jnp.float32)
                pending = shift if pending is None else pending / sigma + shift

            elif kind == "conv":
                weight, bias, stride, pad = blk[1], blk[2], blk[3], blk[4]
                curr, feat = relaxed_conv2d_combined(curr, weight, stride, pad)
                bias_map = jnp.broadcast_to(bias.astype(jnp.float32), feat)
                pending = bias_map if pending is None else (
                    conv_single_map(pending, weight, stride, pad) + bias_map)

            elif kind == "flatten":
                if curr.ndim == 5:
                    flat_from_nhwc = curr.shape[2:]
                curr = curr.reshape(curr.shape[0], curr.shape[1], -1)
                if pending is not None:
                    pending = pending.reshape(-1)

            elif kind == "linear":
                weight, bias = blk[1], blk[2]
                if flat_from_nhwc is not None:
                    # weights were authored for the NCHW flatten order; permute
                    # their columns to HWC ONCE instead of transposing activations
                    Hh, Ww, Cc = flat_from_nhwc
                    weight = weight.reshape(weight.shape[0], Cc, Hh, Ww)
                    weight = weight.transpose(0, 2, 3, 1).reshape(weight.shape[0], -1)
                    flat_from_nhwc = None
                Bx, G, Din = curr.shape
                x2 = curr.reshape(Bx * G, Din).astype(jnp.bfloat16)
                y = matmul_pallas(x2, weight.T.astype(jnp.bfloat16))
                curr = y.reshape(Bx, G, -1)
                new_pending = bias.astype(jnp.float32)
                if pending is not None:
                    new_pending = new_pending + pending.reshape(-1) @ weight.T.astype(jnp.float32)
                pending = new_pending

            elif kind == "relu":
                Bx, G = curr.shape[:2]
                feat = curr.shape[2:]
                D = int(math.prod(feat))
                x3 = curr.reshape(Bx, G, D)
                bias_row = (jnp.zeros((1, D), jnp.float32) if pending is None
                            else pending.reshape(1, D).astype(jnp.float32))
                adv_id = "%d" % j
                if adv_id not in adv_errors:
                    # mirrors torch.FloatTensor(head.shape).unsqueeze(1).uniform_(-1, 1)
                    # (stored in the internal channels-last feature layout)
                    adv_errors[adv_id] = jax.random.uniform(
                        jax.random.PRNGKey(1000 + j), (Bx, 1) + feat, jnp.float32,
                        minval=-1.0, maxval=1.0)
                adv = adv_errors[adv_id].reshape(Bx, D)
                y = relaxed_relu_pallas(x3, bias_row, adv)            # [B, G+1, D] bf16
                curr = y.reshape((Bx, G + 1) + feat)
                pending = None

            else:
                raise AssertionError("Unknown layer type: %s" % kind)

        # Split back into (head, errors) in the reference layout.
        head_out = curr[:, 0].astype(jnp.float32)
        errs_out = curr[:, 1:].astype(jnp.float32)
        if pending is not None:
            head_out = head_out + pending
        if head_out.ndim == 4:                            # channels-last -> NCHW (reference layout)
            head_out = jnp.transpose(head_out, (0, 3, 1, 2))
            errs_out = jnp.transpose(errs_out, (0, 1, 4, 2, 3))
        return head_out, errs_out, None, None, {}

    def forward(self, head, errors, end_layer=None, compute_bounds=False,
                adv_errors=None, return_prop=False):
        # TODO(synk): compute_bounds=True (Cauchy median-of-projections l1 bound
        # path of the reference) is not implemented.
        assert not compute_bounds
        curr_head, curr_errors, res_head, res_errors, _ = self.propagate(
            head, errors, layer_idx=end_layer, adv_errors=adv_errors)
        if return_prop:
            return curr_head, curr_errors, res_head, res_errors
        # Final latent reduction is tiny ([B, n_classes]); plain jnp.
        latent = curr_head + curr_errors.sum(axis=1)
        return latent, None


# ----------------------------------------------------------------------------
# Pure-jnp f32 reference (NCHW, lax.conv) for a numerical sanity check.
# ----------------------------------------------------------------------------
def _reference_forward(blocks, head, errors, adv_errors):
    h = head.astype(jnp.float32)                 # [B, C, H, W]
    e = errors.astype(jnp.float32)               # [B, E, C, H, W]
    for j, blk in enumerate(blocks):
        kind = blk[0]
        if kind == "norm":
            m, s = blk[1], blk[2]
            h = (h - m.reshape(1, -1, 1, 1)) / s.reshape(1, -1, 1, 1)
            e = e / s.reshape(1, 1, -1, 1, 1)
        elif kind == "conv":
            w, b, stride, pad = blk[1], blk[2], blk[3], blk[4]
            dn = ("NCHW", "OIHW", "NCHW")
            conv = lambda z: jax.lax.conv_general_dilated(
                z, w, (stride, stride), [(pad, pad), (pad, pad)], dimension_numbers=dn)
            h = conv(h) + b.reshape(1, -1, 1, 1)
            Bx, E = e.shape[:2]
            e = conv(e.reshape((Bx * E,) + e.shape[2:])).reshape((Bx, E) + h.shape[1:])
        elif kind == "flatten":
            h = h.reshape(h.shape[0], -1)
            e = e.reshape(e.shape[0], e.shape[1], -1)
        elif kind == "linear":
            w, b = blk[1], blk[2]
            h = h @ w.T + b
            e = e @ w.T
        elif kind == "relu":
            adv = adv_errors["%d" % j]
            if h.ndim == 4 and adv.ndim == 5:    # stored channels-last -> NCHW
                adv = jnp.transpose(adv, (0, 1, 4, 2, 3))
            adv = adv.reshape((h.shape[0], 1) + h.shape[1:])
            l1 = jnp.abs(e).sum(axis=1)
            lb, ub = h - l1, h + l1
            cross = jnp.logical_and(lb < 0.0, ub > 0.0)
            denom = ub - lb + 1e-6
            lam = jnp.where(cross, ub / denom, (lb >= 0.0).astype(jnp.float32))
            mu = jnp.where(cross, -0.5 * ub * lb / denom, 0.0)
            h = lam * h + mu
            e = jnp.concatenate([e * lam[:, None], mu[:, None] * adv], axis=1)
    return h + e.sum(axis=1)


# ----------------------------------------------------------------------------
# Main
# ----------------------------------------------------------------------------
if __name__ == "__main__":
    key = jax.random.PRNGKey(0)
    k_head, k_err, k_cw, k_cb, k_l1w, k_l1b, k_l2w, k_l2b = jax.random.split(key, 8)

    B, C, H, W = 2, 4, 16, 16
    E0 = 8          # initial zonotope error terms
    COUT = 128      # lane-dense conv output channels (feeds the Pallas matmul unpadded)

    head = jax.random.normal(k_head, (B, C, H, W), jnp.float32)
    errors = 0.05 * jax.random.normal(k_err, (B, E0, C, H, W), jnp.float32)

    mean = jnp.array([0.1, 0.2, 0.3, 0.4], jnp.float32)
    sigma = jnp.array([0.5, 0.6, 0.7, 0.8], jnp.float32)
    conv_w = 0.2 * jax.random.normal(k_cw, (COUT, C, 3, 3), jnp.float32)     # Cout,Cin,kh,kw
    conv_b = 0.1 * jax.random.normal(k_cb, (COUT,), jnp.float32)
    d_flat = COUT * 8 * 8
    l1_w = 0.02 * jax.random.normal(k_l1w, (32, d_flat), jnp.float32)        # torch NCHW-flatten order
    l1_b = 0.1 * jax.random.normal(k_l1b, (32,), jnp.float32)
    l2_w = 0.2 * jax.random.normal(k_l2w, (10, 32), jnp.float32)
    l2_b = 0.1 * jax.random.normal(k_l2b, (10,), jnp.float32)

    blocks = [
        ("norm", mean, sigma),
        ("conv", conv_w, conv_b, 2, 1),    # 4x16x16 -> 128x8x8 (stride 2, pad 1)
        ("relu",),
        ("flatten",),
        ("linear", l1_w, l1_b),            # 8192 -> 32
        ("relu",),
        ("linear", l2_w, l2_b),            # 32 -> 10
    ]

    net = RelaxedNetworkPallas(blocks, n_rand_proj=None)
    adv_errors = {}
    latent, res_latent = net.forward(head, errors, end_layer=None,
                                     compute_bounds=False, adv_errors=adv_errors)
    jax.block_until_ready(latent)
    assert latent.shape == (B, 10) and res_latent is None
    assert bool(jnp.all(jnp.isfinite(latent)))

    # Numerical sanity check vs. a pure-jnp f32 reference using the same adv errors
    # (generous tolerance: intermediate activations/errors are carried in bf16).
    ref = _reference_forward(blocks, head, errors, adv_errors)
    assert bool(jnp.allclose(latent, ref, rtol=0.1, atol=0.25)), (
        "mismatch vs reference: max |diff| = %f" % float(jnp.max(jnp.abs(latent - ref))))

    print("KERNEL_OK")
</pallas_src>

<mosaic_0001>
module attributes {stable_mosaic.version = 11 : i64} {
  func.func @_matmul_kernel(%arg0: i32, %arg1: i32, %arg2: i32, %arg3: memref<512x36xbf16, #tpu.memory_space<vmem>>, %arg4: memref<36x128xbf16, #tpu.memory_space<vmem>>, %arg5: memref<512x128xf32, #tpu.memory_space<vmem>>, %arg6: memref<512x128xf32, #tpu.memory_space<vmem>>) attributes {dimension_semantics = [#tpu.dimension_semantics<parallel>, #tpu.dimension_semantics<parallel>, #tpu.dimension_semantics<arbitrary>], iteration_bounds = array<i64: 3, 1, 1>, scalar_prefetch = 0 : i64, scratch_operands = 1 : i64, tpu.core_type = #tpu.core_type<tc>, window_params = [{transform_indices = @transform_0, window_bounds = array<i64: 512, 36>}, {transform_indices = @transform_1, window_bounds = array<i64: 36, 128>}, {transform_indices = @transform_2, window_bounds = array<i64: 512, 128>}]} {
    %c0_i32 = arith.constant 0 : i32
    %0 = arith.cmpi eq, %arg2, %c0_i32 : i32
    %1 = arith.extui %0 : i1 to i32
    %c0_i32_0 = arith.constant 0 : i32
    %2 = arith.cmpi ne, %1, %c0_i32_0 : i32
    scf.if %2 {
      %cst_10 = arith.constant 0.000000e+00 : f32
      %12 = vector.broadcast %cst_10 : f32 to vector<512x128xf32>
      %c0_11 = arith.constant 0 : index
      %c0_12 = arith.constant 0 : index
      %13 = vector.load %arg6[%c0_11, %c0_12] : memref<512x128xf32, #tpu.memory_space<vmem>>, vector<512x128xf32>
      tpu.vector_store %arg6[%c0_11, %c0_12], %12 {strides = array<i32>} : memref<512x128xf32, #tpu.memory_space<vmem>>, vector<512x128xf32>,
    } else {
    }
    %c0 = arith.constant 0 : index
    %c0_1 = arith.constant 0 : index
    %3 = vector.load %arg3[%c0, %c0_1] : memref<512x36xbf16, #tpu.memory_space<vmem>>, vector<512x36xbf16>
    %c0_2 = arith.constant 0 : index
    %c0_3 = arith.constant 0 : index
    %4 = vector.load %arg4[%c0_2, %c0_3] : memref<36x128xbf16, #tpu.memory_space<vmem>>, vector<36x128xbf16>
    %c0_4 = arith.constant 0 : index
    %c0_5 = arith.constant 0 : index
    %5 = vector.load %arg6[%c0_4, %c0_5] : memref<512x128xf32, #tpu.memory_space<vmem>>, vector<512x128xf32>
    %cst = arith.constant dense<0.000000e+00> : vector<512x128xf32>
    %6 = tpu.matmul %3, %4, %cst {dimension_numbers = #tpu.dot_dimension_numbers<[1], [0], [0], [1], [0, 0, 1, 1], [], []>} : vector<512x36xbf16>, vector<36x128xbf16>, vector<512x128xf32> -> vector<512x128xf32>
    %7 = arith.addf %5, %6 : vector<512x128xf32>
    %c0_6 = arith.constant 0 : index
    %c0_7 = arith.constant 0 : index
    %8 = vector.load %arg6[%c0_6, %c0_7] : memref<512x128xf32, #tpu.memory_space<vmem>>, vector<512x128xf32>
    tpu.vector_store %arg6[%c0_6, %c0_7], %7 {strides = array<i32>} : memref<512x128xf32, #tpu.memory_space<vmem>>, vector<512x128xf32>,
    %c0_i32_8 = arith.constant 0 : i32
    %9 = arith.cmpi eq, %arg2, %c0_i32_8 : i32
    %10 = arith.extui %9 : i1 to i32
    %c0_i32_9 = arith.constant 0 : i32
    %11 = arith.cmpi ne, %10, %c0_i32_9 : i32
    scf.if %11 {
      %c0_10 = arith.constant 0 : index
      %c0_11 = arith.constant 0 : index
      %12 = vector.load %arg6[%c0_10, %c0_11] : memref<512x128xf32, #tpu.memory_space<vmem>>, vector<512x128xf32>
      %c0_12 = arith.constant 0 : index
      %c0_13 = arith.constant 0 : index
      %13 = vector.load %arg5[%c0_12, %c0_13] : memref<512x128xf32, #tpu.memory_space<vmem>>, vector<512x128xf32>
      tpu.vector_store %arg5[%c0_12, %c0_13], %12 {strides = array<i32>} : memref<512x128xf32, #tpu.memory_space<vmem>>, vector<512x128xf32>,
    } else {
    }
    return
  }
  func.func @transform_0(%arg0: i32, %arg1: i32, %arg2: i32) -> (i32, i32) {
    %c0_i32 = arith.constant 0 : i32
    return %arg0, %arg2 : i32, i32
  }
  func.func @transform_1(%arg0: i32, %arg1: i32, %arg2: i32) -> (i32, i32) {
    %c0_i32 = arith.constant 0 : i32
    return %arg2, %arg1 : i32, i32
  }
  func.func @transform_2(%arg0: i32, %arg1: i32, %arg2: i32) -> (i32, i32) {
    %c0_i32 = arith.constant 0 : i32
    return %arg0, %arg1 : i32, i32
  }
}

</mosaic_0001>

<bundles_post_ra>
// kernel: tpu_custom_call.1
= control target key start
LH: loop header
LB: loop body
LE: loop exit
PB: predicated region body
PF: predicated region fallthrough
CT: control target
= control target key end

     0   :  { %7 = vsyncpa [#allocation4], 0  ;;  %s2040_s0 = inlined_call_operand.vmem [shape: bf16[1152,36], index: 0, kind: input, shape index: {}]   ;;  %s2041_s1 = inlined_call_operand.vmem [shape: bf16[36,128], index: 1, kind: input, shape index: {}]   ;;  %s2042_s2 = inlined_call_operand.hbm [shape: f32[1152,128], index: 2, kind: output, shape index: {}]  }
   0x1   :  { %9 = vsyncpa [#allocation4 + $0x1], 0  ;;  %s1765_s9 = smov 0   ;;  %s1767_s10 = smov 0  }
   0x2   :  { %s1769_s11 = smov 0   ;;  %s1771_s12 = smov 0  }
   0x3   :  { %s1773_s13 = smov 0   ;;  %s1775_s14 = smov 0  }
   0x4 LB: > { %s1377_s15 = sadd.s32 4294967295, %s1745_s14   ;;  %s1378_s16 = sadd.s32 4294967294, %s1745_s14   ;;  %s1745_s14 = sphi %s1775_s14, %s15_s14   ;;  %s1741_s13 = sphi %s1773_s13, %s2049_s13   ;;  %s1737_s12 = sphi %s1771_s12, %s2048_s12   ;;  %s1733_s11 = sphi %s1769_s11, %s2047_s11   ;;  %s1729_s10 = sphi %s1767_s10, %s2046_s10   ;;  %s1725_s9 = sphi %s1765_s9, %s2045_s9  }
   0x5   : > { %s34_s17 = sadd.s32 1, %s1741_s13  ;;  %s99_s18 = sadd.s32 1, %s1733_s11 }
   0x6   : > { %p36_p0 = scmp.ge.s32.totalorder %s34_s17, 3  ;;  %p109_p1 = scmp.ne.s32.totalorder %s1733_s11, %s1729_s10 }
   0x7   : > { %p110_p2 = scmp.eq.s32.totalorder %s1377_s15, 2  ;;  %p115_p3 = scmp.ne.s32.totalorder %s1729_s10, %s1725_s9 }
   0x8   : > { %s2051_s17 = smov (%p36_p0, %s34_s17), 0  ;;  %p116_p5 = scmp.eq.s32.totalorder %s1378_s16, 2 }
   0x9   : > { %p1805_p4 = por %p110_p2, %p109_p1  ;;  %s94_s20 = ssub.s32 %s1741_s13, %s2051_s17 }
   0xa   : > { %p1382_p6 = scmp.ge.s32.totalorder %s1745_s14, 1  ;;  %p97_p7 = scmp.eq.s32.totalorder %s94_s20, 0 }
   0xb   : > { %p1812_p8 = por %p116_p5, %p115_p3  ;;  %p166_p9 = scmp.lt.s32.totalorder %s1745_s14, 4 }
   0xc   : > { %s1818_s22 = scalar_select %p97_p7, %s1733_s11, %s99_s18  }
   0xd   : > { %p167_p10 = pnand %p1382_p6, %p166_p9 }
   0xe   : > { %v1632_v0 = vld [vmem:[%s2041_s1] sm:$0xff] (!%p167_p10)   ;;  %v1633_v1 = vld [vmem:[%s2041_s1 + $0x8] sm:$0xff] (!%p167_p10)   ;;  %s1827_s27 = sshll.u32 (!%p167_p10), %s1737_s12, 6  ;;  %v1634_v2 = vld [vmem:[%s2041_s1 + $0x10] ss:$0 sps:$4 sm:$0x33] (!%p167_p10)  }
   0xf   : > { %170 = sbr.rel (%p167_p10) target bundleno = 329 (0x149), region = 28  ;;  %1498 = vmatprep.subr.bf16.mxu0 (!%p167_p10), %v1632_v0  ;;  %1568 = vmatprep.subr.bf16.mxu1 (!%p167_p10), %v1632_v0  ;;  %p208_p11 = scmp.lt.s32.totalorder (!%p167_p10), %s1827_s27, 143  ;;  %vm708_vm0 = vcmask (!%p167_p10), 1041408   ;;  %vm611_vm1 = vcmask (!%p167_p10), 293888  }
  0x10   : > { %1499 = vmatpush3.bf16.msra.mxu0 (!%p167_p10), %v1632_v0  ;;  %1571 = vmatpush3.bf16.msra.mxu1 (!%p167_p10), %v1632_v0  ;;  %v710_v3 = vsel (!%p167_p10), %vm708_vm0, %v1634_v2, 0  ;;  %s200_s7 = sand.u32 (!%p167_p10), 1, %s1729_s10  }
  0x11   : > { %1500 = vmatprep.subr.bf16.mxu0 (!%p167_p10), %v1633_v1  ;;  %1569 = vmatprep.subr.bf16.mxu1 (!%p167_p10), %v1633_v1  ;;  %s1383_s8 = sshll.u32 (!%p167_p10), %s200_s7, 9  ;;  %s1974_s16 = scalar_lea.sflag (!%p167_p10), [#allocation4], %s200_s7 }
  0x12   : > { %s1906_s15 = scalar_lea.vmem (!%p167_p10), [#allocation3], %s1383_s8 }
  0x14   : > { %1501 = vmatpush3.bf16.msra.mxu0 (!%p167_p10), %v1633_v1  ;;  %1572 = vmatpush3.bf16.msra.mxu1 (!%p167_p10), %v1633_v1 }
  0x15   : > { %1574 = vmatprep.subr.msk.bf16.mxu0 (!%p167_p10), %vm708_vm0, %v1634_v2  ;;  %1575 = vmatprep.subr.msk.bf16.mxu1 (!%p167_p10), %vm708_vm0, %v1634_v2 }
  0x16   : > { %s209_s30 = scalar_select %p208_p11, %s1827_s27, 143 }
  0x17   : > { %s1269_s18 = ssub.s32 (%p1805_p4), 144, %s1827_s27 }
  0x18   : > { %s1385_s3 = sshll.u32 %s209_s30, 2  ;;  %1503 = vmatpush3.bf16.msra.mxu0 %v710_v3  ;;  %1573 = vmatpush3.bf16.msra.mxu1 %v710_v3  ;;  %p1270_p12 = scmp.lt.s32.totalorder (%p1805_p4), %s1269_s18, 64 }
  0x19   : > { %s1837_s6 = scalar_lea.vmem %s2040_s0, %s1385_s3 }
  0x1a   : > { %v1635_v4 = vld [vmem:[%s1837_s6] sm:$0xff]   ;;  %v1637_v6 = vld [vmem:[%s1837_s6 + $0x8] sm:$0xff]   ;;  %v1639_v8 = vld [vmem:[%s1837_s6 + $0x10] sm:$0xff]  }
  0x1b   : > { %v1636_v5 = vld [vmem:[%s1837_s6 + $0x80] sm:$0xff]   ;;  %1504 = vmatprep.mubr.msk.bf16.mxu0 %vm611_vm1, %v1635_v4  ;;  %v1638_v7 = vld [vmem:[%s1837_s6 + $0x88] sm:$0xff]   ;;  %v1640_v9 = vld [vmem:[%s1837_s6 + $0x90] sm:$0xff]  }
  0x1c   : > { %1536 = vmatprep.mubr.msk.bf16.mxu1 %vm611_vm1, %v1636_v5  ;;  %1505 = vmatmul.mubr.msk.bf16.vlgmr.msra.gmra.mrb[0].mxu0 %vm611_vm1, %v1637_v6  ;;  %v1641_v10 = vld [vmem:[%s1837_s6 + $0x18] sm:$0xff]   ;;  %v1643_v12 = vld [vmem:[%s1837_s6 + $0x20] sm:$0xff]   ;;  %v1645_v14 = vld [vmem:[%s1837_s6 + $0x28] sm:$0xff]  }
  0x1d   : > { %1537 = vmatmul.mubr.msk.bf16.vlgmr.msra.gmra.mrb[0].mxu1 %vm611_vm1, %v1638_v7  ;;  %1508 = vmatprep.mubr.msk.bf16.mxu0 %vm611_vm1, %v1639_v8  ;;  %v1642_v11 = vld [vmem:[%s1837_s6 + $0x98] sm:$0xff]   ;;  %v1644_v13 = vld [vmem:[%s1837_s6 + $0xa0] sm:$0xff]   ;;  %v1646_v15 = vld [vmem:[%s1837_s6 + $0xa8] sm:$0xff]  }
  0x1e   : > { %1540 = vmatprep.mubr.msk.bf16.mxu1 %vm611_vm1, %v1640_v9  ;;  %v1647_v16 = vld [vmem:[%s1837_s6 + $0x30] sm:$0xff]   ;;  %v1649_v18 = vld [vmem:[%s1837_s6 + $0x38] sm:$0xff]   ;;  %v1651_v20 = vld [vmem:[%s1837_s6 + $0x40] sm:$0xff]  }
  0x1f   : > { %v1648_v17 = vld [vmem:[%s1837_s6 + $0xb0] sm:$0xff]   ;;  %v1650_v19 = vld [vmem:[%s1837_s6 + $0xb8] sm:$0xff]   ;;  %v1652_v21 = vld [vmem:[%s1837_s6 + $0xc0] sm:$0xff]  }
  0x20   : > { %v1653_v22 = vld [vmem:[%s1837_s6 + $0x48] sm:$0xff]   ;;  %v1655_v24 = vld [vmem:[%s1837_s6 + $0x50] sm:$0xff]   ;;  %v1657_v26 = vld [vmem:[%s1837_s6 + $0x58] sm:$0xff]  }
  0x21   : > { %v1654_v23 = vld [vmem:[%s1837_s6 + $0xc8] sm:$0xff]   ;;  %v1656_v25 = vld [vmem:[%s1837_s6 + $0xd0] sm:$0xff]   ;;  %v1658_v27 = vld [vmem:[%s1837_s6 + $0xd8] sm:$0xff]  }
  0x22   : > { %v1659_v28 = vld [vmem:[%s1837_s6 + $0x60] sm:$0xff]   ;;  %v1661_v30 = vld [vmem:[%s1837_s6 + $0x68] sm:$0xff]   ;;  %v1663_v32 = vld [vmem:[%s1837_s6 + $0x70] sm:$0xff]  }
  0x23   : > { %v1660_v29 = vld [vmem:[%s1837_s6 + $0xe0] sm:$0xff]   ;;  %v1662_v31 = vld [vmem:[%s1837_s6 + $0xe8] sm:$0xff]   ;;  %v1664_v33 = vld [vmem:[%s1837_s6 + $0xf0] sm:$0xff]  }
  0x24   : > { %1509 = vmatmul.mubr.msk.bf16.gmra.mrb[4].mxu0 %vm611_vm1, %v1641_v10  ;;  %v1665_v34 = vld [vmem:[%s1837_s6 + $0x78] sm:$0xff]  }
  0x25   : > { %1541 = vmatmul.mubr.msk.bf16.gmra.mrb[4].mxu1 %vm611_vm1, %v1642_v11  ;;  %1512 = vmatprep.mubr.msk.bf16.mxu0 %vm611_vm1, %v1643_v12  ;;  %v1666_v35 = vld [vmem:[%s1837_s6 + $0xf8] sm:$0xff]  }
  0x26   : > { %1544 = vmatprep.mubr.msk.bf16.mxu1 %vm611_vm1, %v1644_v13 }
  0x2c   : > { %1513 = vmatmul.mubr.msk.bf16.gmra.mrb[8].mxu0 %vm611_vm1, %v1645_v14 }
  0x2d   : > { %1545 = vmatmul.mubr.msk.bf16.gmra.mrb[8].mxu1 %vm611_vm1, %v1646_v15  ;;  %1516 = vmatprep.mubr.msk.bf16.mxu0 %vm611_vm1, %v1647_v16 }
  0x2e   : > { %1548 = vmatprep.mubr.msk.bf16.mxu1 %vm611_vm1, %v1648_v17 }
  0x34   : > { %1517 = vmatmul.mubr.msk.bf16.gmra.mrb[12].mxu0 %vm611_vm1, %v1649_v18 }
  0x35   : > { %1549 = vmatmul.mubr.msk.bf16.gmra.mrb[12].mxu1 %vm611_vm1, %v1650_v19  ;;  %1520 = vmatprep.mubr.msk.bf16.mxu0 %vm611_vm1, %v1651_v20 }
  0x36   : > { %1552 = vmatprep.mubr.msk.bf16.mxu1 %vm611_vm1, %v1652_v21 }
  0x3c   : > { %1521 = vmatmul.mubr.msk.bf16.gmra.mrb[16].mxu0 %vm611_vm1, %v1653_v22 }
  0x3d   : > { %1553 = vmatmul.mubr.msk.bf16.gmra.mrb[16].mxu1 %vm611_vm1, %v1654_v23  ;;  %1524 = vmatprep.mubr.msk.bf16.mxu0 %vm611_vm1, %v1655_v24 }
  0x3e   : > { %1556 = vmatprep.mubr.msk.bf16.mxu1 %vm611_vm1, %v1656_v25 }
  0x44   : > { %1525 = vmatmul.mubr.msk.bf16.gmra.mrb[20].mxu0 %vm611_vm1, %v1657_v26 }
  0x45   : > { %1557 = vmatmul.mubr.msk.bf16.gmra.mrb[20].mxu1 %vm611_vm1, %v1658_v27  ;;  %1528 = vmatprep.mubr.msk.bf16.mxu0 %vm611_vm1, %v1659_v28 }
  0x46   : > { %1560 = vmatprep.mubr.msk.bf16.mxu1 %vm611_vm1, %v1660_v29 }
  0x4c   : > { %1529 = vmatmul.mubr.msk.bf16.gmra.mrb[24].mxu0 %vm611_vm1, %v1661_v30 }
  0x4d   : > { %1561 = vmatmul.mubr.msk.bf16.gmra.mrb[24].mxu1 %vm611_vm1, %v1662_v31  ;;  %1532 = vmatprep.mubr.msk.bf16.mxu0 %vm611_vm1, %v1663_v32 }
  0x4e   : > { %1564 = vmatprep.mubr.msk.bf16.mxu1 %vm611_vm1, %v1664_v33 }
  0x54   : > { %1533 = vmatmul.mubr.msk.bf16.gmra.mrb[28].mxu0 %vm611_vm1, %v1665_v34 }
  0x55   : > { %1565 = vmatmul.mubr.msk.bf16.gmra.mrb[28].mxu1 %vm611_vm1, %v1666_v35 }
  0xef   : > { %v1506_v36 = vpop.f32.mrb[0].mxu0 }
  0xf0   : > { %v1538_v37 = vpop.f32.mrb[0].mxu1  ;;  %1198 = vst [vmem:[%s1906_s15 + $0x10] sm:$0xff] %v1506_v36  ;;  %v746_v38 = vpop.f32.mrb[1].mxu0 }
  0xf1   : > { %1230 = vst [vmem:[%s1906_s15 + $0x110] sm:$0xff] %v1538_v37  ;;  %v874_v39 = vpop.f32.mrb[1].mxu1  ;;  %1196 = vst [vmem:[%s1906_s15] sm:$0xff] %v746_v38  ;;  %v1507_v40 = vpop.f32.mrb[2].mxu0 }
  0xf2   : > { %1228 = vst [vmem:[%s1906_s15 + $0x100] sm:$0xff] %v874_v39  ;;  %v1539_v41 = vpop.f32.mrb[2].mxu1  ;;  %1199 = vst [vmem:[%s1906_s15 + $0x18] sm:$0xff] %v1507_v40  ;;  %v749_v42 = vpop.f32.mrb[3].mxu0 }
  0xf3   : > { %1231 = vst [vmem:[%s1906_s15 + $0x118] sm:$0xff] %v1539_v41  ;;  %v877_v43 = vpop.f32.mrb[3].mxu1  ;;  %1197 = vst [vmem:[%s1906_s15 + $0x8] sm:$0xff] %v749_v42 }
  0xf4   : > { %1229 = vst [vmem:[%s1906_s15 + $0x108] sm:$0xff] %v877_v43 }
  0xf7   : > { %v1510_v44 = vpop.f32.mrb[4].mxu0 }
  0xf8   : > { %v1542_v45 = vpop.f32.mrb[4].mxu1  ;;  %1202 = vst [vmem:[%s1906_s15 + $0x30] sm:$0xff] %v1510_v44  ;;  %v762_v46 = vpop.f32.mrb[5].mxu0 }
  0xf9   : > { %1234 = vst [vmem:[%s1906_s15 + $0x130] sm:$0xff] %v1542_v45  ;;  %v890_v47 = vpop.f32.mrb[5].mxu1  ;;  %1200 = vst [vmem:[%s1906_s15 + $0x20] sm:$0xff] %v762_v46  ;;  %v1511_v48 = vpop.f32.mrb[6].mxu0 }
  0xfa   : > { %1232 = vst [vmem:[%s1906_s15 + $0x120] sm:$0xff] %v890_v47  ;;  %v1543_v49 = vpop.f32.mrb[6].mxu1  ;;  %1203 = vst [vmem:[%s1906_s15 + $0x38] sm:$0xff] %v1511_v48  ;;  %v765_v50 = vpop.f32.mrb[7].mxu0 }
  0xfb   : > { %1235 = vst [vmem:[%s1906_s15 + $0x138] sm:$0xff] %v1543_v49  ;;  %v893_v51 = vpop.f32.mrb[7].mxu1  ;;  %1201 = vst [vmem:[%s1906_s15 + $0x28] sm:$0xff] %v765_v50 }
  0xfc   : > { %1233 = vst [vmem:[%s1906_s15 + $0x128] sm:$0xff] %v893_v51 }
  0xff   : > { %v1514_v52 = vpop.f32.mrb[8].mxu0 }
 0x100   : > { %v1546_v53 = vpop.f32.mrb[8].mxu1  ;;  %1206 = vst [vmem:[%s1906_s15 + $0x50] sm:$0xff] %v1514_v52  ;;  %v778_v54 = vpop.f32.mrb[9].mxu0 }
 0x101   : > { %1238 = vst [vmem:[%s1906_s15 + $0x150] sm:$0xff] %v1546_v53  ;;  %v906_v55 = vpop.f32.mrb[9].mxu1  ;;  %1204 = vst [vmem:[%s1906_s15 + $0x40] sm:$0xff] %v778_v54  ;;  %v1515_v56 = vpop.f32.mrb[10].mxu0 }
 0x102   : > { %1236 = vst [vmem:[%s1906_s15 + $0x140] sm:$0xff] %v906_v55  ;;  %v1547_v57 = vpop.f32.mrb[10].mxu1  ;;  %1207 = vst [vmem:[%s1906_s15 + $0x58] sm:$0xff] %v1515_v56  ;;  %v781_v58 = vpop.f32.mrb[11].mxu0 }
 0x103   : > { %1239 = vst [vmem:[%s1906_s15 + $0x158] sm:$0xff] %v1547_v57  ;;  %v909_v59 = vpop.f32.mrb[11].mxu1  ;;  %1205 = vst [vmem:[%s1906_s15 + $0x48] sm:$0xff] %v781_v58 }
 0x104   : > { %1237 = vst [vmem:[%s1906_s15 + $0x148] sm:$0xff] %v909_v59 }
 0x107   : > { %v1518_v60 = vpop.f32.mrb[12].mxu0 }
 0x108   : > { %v1550_v61 = vpop.f32.mrb[12].mxu1  ;;  %1210 = vst [vmem:[%s1906_s15 + $0x70] sm:$0xff] %v1518_v60  ;;  %v794_v62 = vpop.f32.mrb[13].mxu0 }
 0x109   : > { %1242 = vst [vmem:[%s1906_s15 + $0x170] sm:$0xff] %v1550_v61  ;;  %v922_v63 = vpop.f32.mrb[13].mxu1  ;;  %1208 = vst [vmem:[%s1906_s15 + $0x60] sm:$0xff] %v794_v62  ;;  %v1519_v0 = vpop.f32.mrb[14].mxu0 }
 0x10a   : > { %1240 = vst [vmem:[%s1906_s15 + $0x160] sm:$0xff] %v922_v63  ;;  %v1551_v1 = vpop.f32.mrb[14].mxu1  ;;  %1211 = vst [vmem:[%s1906_s15 + $0x78] sm:$0xff] %v1519_v0  ;;  %v797_v2 = vpop.f32.mrb[15].mxu0 }
 0x10b   : > { %1243 = vst [vmem:[%s1906_s15 + $0x178] sm:$0xff] %v1551_v1  ;;  %v925_v3 = vpop.f32.mrb[15].mxu1  ;;  %1209 = vst [vmem:[%s1906_s15 + $0x68] sm:$0xff] %v797_v2 }
 0x10c   : > { %1241 = vst [vmem:[%s1906_s15 + $0x168] sm:$0xff] %v925_v3 }
 0x10f   : > { %v1522_v4 = vpop.f32.mrb[16].mxu0 }
 0x110   : > { %v1554_v5 = vpop.f32.mrb[16].mxu1  ;;  %1214 = vst [vmem:[%s1906_s15 + $0x90] sm:$0xff] %v1522_v4  ;;  %v810_v6 = vpop.f32.mrb[17].mxu0 }
 0x111   : > { %1246 = vst [vmem:[%s1906_s15 + $0x190] sm:$0xff] %v1554_v5  ;;  %v938_v7 = vpop.f32.mrb[17].mxu1  ;;  %1212 = vst [vmem:[%s1906_s15 + $0x80] sm:$0xff] %v810_v6  ;;  %v1523_v8 = vpop.f32.mrb[18].mxu0 }
 0x112   : > { %1244 = vst [vmem:[%s1906_s15 + $0x180] sm:$0xff] %v938_v7  ;;  %v1555_v9 = vpop.f32.mrb[18].mxu1  ;;  %1215 = vst [vmem:[%s1906_s15 + $0x98] sm:$0xff] %v1523_v8  ;;  %v813_v10 = vpop.f32.mrb[19].mxu0 }
 0x113   : > { %1247 = vst [vmem:[%s1906_s15 + $0x198] sm:$0xff] %v1555_v9  ;;  %v941_v11 = vpop.f32.mrb[19].mxu1  ;;  %1213 = vst [vmem:[%s1906_s15 + $0x88] sm:$0xff] %v813_v10 }
 0x114   : > { %1245 = vst [vmem:[%s1906_s15 + $0x188] sm:$0xff] %v941_v11 }
 0x117   : > { %v1526_v12 = vpop.f32.mrb[20].mxu0 }
 0x118   : > { %v1558_v13 = vpop.f32.mrb[20].mxu1  ;;  %1218 = vst [vmem:[%s1906_s15 + $0xb0] sm:$0xff] %v1526_v12  ;;  %v826_v14 = vpop.f32.mrb[21].mxu0 }
 0x119   : > { %1250 = vst [vmem:[%s1906_s15 + $0x1b0] sm:$0xff] %v1558_v13  ;;  %v954_v15 = vpop.f32.mrb[21].mxu1  ;;  %1216 = vst [vmem:[%s1906_s15 + $0xa0] sm:$0xff] %v826_v14  ;;  %v1527_v16 = vpop.f32.mrb[22].mxu0 }
 0x11a   : > { %1248 = vst [vmem:[%s1906_s15 + $0x1a0] sm:$0xff] %v954_v15  ;;  %v1559_v17 = vpop.f32.mrb[22].mxu1  ;;  %1219 = vst [vmem:[%s1906_s15 + $0xb8] sm:$0xff] %v1527_v16  ;;  %v829_v18 = vpop.f32.mrb[23].mxu0 }
 0x11b   : > { %1251 = vst [vmem:[%s1906_s15 + $0x1b8] sm:$0xff] %v1559_v17  ;;  %v957_v19 = vpop.f32.mrb[23].mxu1  ;;  %1217 = vst [vmem:[%s1906_s15 + $0xa8] sm:$0xff] %v829_v18 }
 0x11c   : > { %1249 = vst [vmem:[%s1906_s15 + $0x1a8] sm:$0xff] %v957_v19 }
 0x11f   : > { %v1530_v20 = vpop.f32.mrb[24].mxu0 }
 0x120   : > { %v1562_v21 = vpop.f32.mrb[24].mxu1  ;;  %1222 = vst [vmem:[%s1906_s15 + $0xd0] sm:$0xff] %v1530_v20  ;;  %v842_v22 = vpop.f32.mrb[25].mxu0 }
 0x121   : > { %1254 = vst [vmem:[%s1906_s15 + $0x1d0] sm:$0xff] %v1562_v21  ;;  %v970_v23 = vpop.f32.mrb[25].mxu1  ;;  %1220 = vst [vmem:[%s1906_s15 + $0xc0] sm:$0xff] %v842_v22  ;;  %v1531_v24 = vpop.f32.mrb[26].mxu0 }
 0x122   : > { %1252 = vst [vmem:[%s1906_s15 + $0x1c0] sm:$0xff] %v970_v23  ;;  %v1563_v25 = vpop.f32.mrb[26].mxu1  ;;  %1223 = vst [vmem:[%s1906_s15 + $0xd8] sm:$0xff] %v1531_v24  ;;  %v845_v26 = vpop.f32.mrb[27].mxu0 }
 0x123   : > { %1255 = vst [vmem:[%s1906_s15 + $0x1d8] sm:$0xff] %v1563_v25  ;;  %v973_v27 = vpop.f32.mrb[27].mxu1  ;;  %1221 = vst [vmem:[%s1906_s15 + $0xc8] sm:$0xff] %v845_v26 }
 0x124   : > { %1253 = vst [vmem:[%s1906_s15 + $0x1c8] sm:$0xff] %v973_v27 }
 0x126   : > { %1267 = sbr.rel (!%p1805_p4) target bundleno = 329 (0x149), region = 40 }
 0x127   : > { %v1534_v28 = vpop.f32.mrb[28].mxu0 }
 0x128   : > { %v1566_v29 = vpop.f32.mrb[28].mxu1  ;;  %1226 = vst [vmem:[%s1906_s15 + $0xf0] sm:$0xff] %v1534_v28  ;;  %v858_v30 = vpop.f32.mrb[29].mxu0 }
 0x129   : > { %1258 = vst [vmem:[%s1906_s15 + $0x1f0] sm:$0xff] %v1566_v29  ;;  %v986_v31 = vpop.f32.mrb[29].mxu1  ;;  %1224 = vst [vmem:[%s1906_s15 + $0xe0] sm:$0xff] %v858_v30  ;;  %v1535_v32 = vpop.f32.mrb[30].mxu0 }
 0x12a   : > { %1256 = vst [vmem:[%s1906_s15 + $0x1e0] sm:$0xff] %v986_v31  ;;  %v1567_v33 = vpop.f32.mrb[30].mxu1  ;;  %1227 = vst [vmem:[%s1906_s15 + $0xf8] sm:$0xff] %v1535_v32  ;;  %v861_v34 = vpop.f32.mrb[31].mxu0 }
 0x12b   : > { %1259 = vst [vmem:[%s1906_s15 + $0x1f8] sm:$0xff] %v1567_v33  ;;  %v989_v35 = vpop.f32.mrb[31].mxu1  ;;  %1225 = vst [vmem:[%s1906_s15 + $0xe8] sm:$0xff] %v861_v34 }
 0x12c   : > { %1257 = vst [vmem:[%s1906_s15 + $0x1e8] sm:$0xff] %v989_v35 }
 0x12d   : > { %s2053_s18 = smov (!%p1270_p12, %s1269_s18), 64 }
 0x12e   : > { %s1979_s20 = sshll.u32 %s2053_s18, 7 }
 0x12f   : > { %s1274_s23 = ssub.s32 8192, %s1979_s20 }
 0x130   : > { %1275 = vsyncadd %s1974_s16, %s1274_s23  ;;  %p1456_p13 = scmp.ne.s32.totalorder %s1979_s20, 0  ;;  %s1462_s24 = sshll.u32 %s1737_s12, 13 }
 0x131   : > { %s1988_s26 = scalar_lea.hbm %s2042_s2, %s1462_s24  ;;  %s1281_s27 = sshll.u32 %s1906_s15, 4  ;;  %s1991_s27 = int_to_ptr.vmem [resolvable:$true] %s1281_s27 }
 0x132   : > { %s1667_s28 = scalar_lea.vmem %s1991_s27, %s1979_s20  ;;  %s1747_s29 = smov [#allocation3]  }
 0x133   : > { %p1668_p0 = scmp.ne.s32.totalorder %s1991_s27, %s1667_s28  ;;  %s1671_s30 = sshll.u32 %s1747_s29, 4  ;;  %s1672_s30 = int_to_ptr.vmem [resolvable:$false] %s1671_s30 }
 0x134   : > { %s1673_s12 = scalar_lea.vmem %s1672_s30, 16384  ;;  %p1674_p3 = scmp.lt.s32.totalorder %s1991_s27, %s1672_s30 }
 0x135   : > { %p1669_p1 = pnand %p1668_p0, %p1456_p13  ;;  %p1675_p4 = scmp.lt.s32.totalorder %s1673_s12, %s1667_s28 }
 0x137   : > { %p1670_p2 = pneg %p1669_p1  ;;  %p1676_p5 = por %p1675_p4, %p1674_p3 }
 0x139   : > { %p1677_p6 = pnand %p1676_p5, %p1670_p2 }
 0x13b   : > { %1680 = shalt.err (!%p1677_p6)
}
 0x13c   : > { %s1681_s3 = scalar_lea.hbm %s1988_s26, %s1979_s20  ;;  %s1685_s6 = scalar_lea.hbm %s2042_s2, 18432 }
 0x13d   : > { %p1682_p7 = scmp.ne.s32.totalorder %s1988_s26, %s1681_s3  ;;  %p1686_p11 = scmp.lt.u32.totalorder %s1988_s26, %s2042_s2 }
 0x13e   : > { %p1687_p12 = scmp.lt.u32.totalorder %s1685_s6, %s1681_s3  ;;  %p1689_p1 = scmp.lt.u32.totalorder %s1681_s3, %s1988_s26 }
 0x13f   : > { %p1683_p9 = pnand %p1682_p7, %p1456_p13 }
 0x140   : > { %p1688_p0 = por %p1687_p12, %p1686_p11 }
 0x141   : > { %p1684_p10 = pneg %p1683_p9 }
 0x142   : > { %p1690_p2 = por %p1689_p1, %p1688_p0 }
 0x144   : > { %p1691_p3 = pnand %p1690_p2, %p1684_p10 }
 0x146   : > { %1694 = shalt.err (!%p1691_p3)
}
 0x147   : > { %s1748_s15 = smov 128   ;;  %s1749_s18 = smov 8  }
 0x148   : > { %1287 = dma.vmem_to_hbm [thread:$0]  (%p1456_p13), %s1991_s27, %s1979_s20, %s1988_s26, %s1974_s16, %s1748_s15, %s1748_s15, %s1749_s18  }
 0x149 PF: > { %p1581_p4 = scmp.ge.s32.totalorder %s1745_s14, 2  ;;  %s1296_s23 = sand.u32 1, %s1725_s9  }
 0x14a   : > { %s1297_s24 = scalar_lea.sflag [#allocation4], %s1296_s23 }
 0x14b   : > { %p1578_p5 = pnand %p1581_p4, %p1812_p8 }
 0x14d   : > { %1720 = dma.done.wait (!%p1578_p5), %s1297_s24, 8192  }
 0x14e   : > { %1722 = vsyncadd (!%p1578_p5), %s1297_s24, 4294959104  ;;  %s15_s14 = sadd.s32 1, %s1745_s14   ;;  %s2045_s9 = smov %s1729_s10 }
 0x14f   : > { %p12_p6 = scmp.ge.s32.totalorder %s15_s14, 5   ;;  %s2046_s10 = smov %s1733_s11 }
 0x150   : > { %s2047_s11 = smov %s1818_s22  ;;  %s2048_s12 = smov %s1741_s13 }
 0x151   : > { %s2049_s13 = smov %s2051_s17  ;;  %14 = sbr.rel (!%p12_p6) target bundleno = 4 (0x4), region = 74 }
 0x158   :  { %1302 = vsyncpa [#allocation4], 1 }
 0x159   :  { %1304 = vsyncpa [#allocation4 + $0x1], 1 }

</bundles_post_ra>
